<compile_context>
chip_gen: v7x
topology: tpu7x:2x2x1
jax: 0.10.0
libtpu: 0.0.40
codegen_flags: <defaults>
</compile_context>

<pallas_src>
import functools

import jax
import jax.numpy as jnp
from jax.experimental import pallas as pl
from jax.experimental.pallas import tpu as pltpu

_NEG_INF = -1e30  # bias for padded fc3 rows -> exp() == 0 exactly


def policy_net_kernel(xT_ref, w1_ref, b1_ref, w2_ref, b2_ref, w3_ref, b3_ref,
                      o_ref):
    xT = xT_ref[...]                                                   # (N, TB) bf16

    # fc1 + relu  (bf16 MXU operands, f32 accumulation, f32 epilogue)
    h1 = jnp.dot(w1_ref[...], xT, preferred_element_type=jnp.float32)
    h1 = jnp.maximum(h1 + b1_ref[...], 0.0)                           # (32, TB) f32

    # fc2 + relu
    h2 = jnp.dot(w2_ref[...], h1.astype(jnp.bfloat16),
                 preferred_element_type=jnp.float32)
    h2 = jnp.maximum(h2 + b2_ref[...], 0.0)                           # (16, TB) f32

    # fc3 + softmax over the K (sublane) axis.  Rows >= K carry zero weights
    # and a -1e30 bias, so they contribute exactly 0 to the normalization.
    logits = jnp.dot(w3_ref[...], h2.astype(jnp.bfloat16),
                     preferred_element_type=jnp.float32)
    logits = logits + b3_ref[...]                                      # (KP, TB) f32
    m = jnp.max(logits, axis=0, keepdims=True)
    e = jnp.exp(logits - m)
    denom = jnp.sum(e, axis=0, keepdims=True)
    o_ref[...] = e / denom                                             # exact divide


def _choose_batch_tiling(B, tb):
    """Pick (TB, n_tiles): TB a multiple of 128, padding waste bounded by
    (n_tiles-1)*128 columns, and >= 2 grid steps when the batch allows it so
    v7x's two TensorCores both get work."""
    blocks = pl.cdiv(B, 128)                  # 128-lane batch blocks
    tb_blocks = max(1, tb // 128)
    n_tiles = pl.cdiv(blocks, tb_blocks)
    if blocks >= 2 and n_tiles < 2:
        n_tiles = 2
    tile_blocks = pl.cdiv(blocks, n_tiles)
    return tile_blocks * 128, n_tiles


@functools.partial(jax.jit, static_argnames=("tb",))
def policy_net_forward(x, params, *, tb=16384):
    """x: (B, N) f32.  Weights stored like nn.Linear: (out, in); biases (out, 1)."""
    w1, b1 = params["w1"], params["b1"]
    w2, b2 = params["w2"], params["b2"]
    w3, b3 = params["w3"], params["b3"]

    B, N = x.shape
    K = w3.shape[0]

    # Pad fc3 to a multiple of 8 output rows -> sublane-aligned output slab.
    KP = max(8, pl.cdiv(K, 8) * 8)
    if KP != K:
        w3 = jnp.concatenate([w3, jnp.zeros((KP - K, w3.shape[1]), w3.dtype)], 0)
        b3 = jnp.concatenate([b3, jnp.full((KP - K, 1), _NEG_INF, b3.dtype)], 0)

    TB, n_tiles = _choose_batch_tiling(B, tb)
    B_pad = TB * n_tiles

    # Batch on the lane axis.  Single fused pass: bf16 cast (half the HBM
    # bytes), transpose, pad to the tiled batch extent.
    xT = jnp.pad(x.astype(jnp.bfloat16).T, ((0, 0), (0, B_pad - B)))   # (N, B_pad)

    w1b, w2b, w3b = (w.astype(jnp.bfloat16) for w in (w1, w2, w3))

    # Weights/biases: whole-array VMEM blocks with constant block index, so
    # they stay VMEM-resident across grid steps (no per-step re-DMA).
    const = lambda a: pl.BlockSpec(a.shape, lambda i: (0,) * a.ndim)

    outT = pl.pallas_call(
        policy_net_kernel,
        out_shape=jax.ShapeDtypeStruct((KP, B_pad), jnp.float32),
        grid=(n_tiles,),
        in_specs=[pl.BlockSpec((N, TB), lambda i: (0, i)),
                  const(w1b), const(b1), const(w2b), const(b2),
                  const(w3b), const(b3)],
        out_specs=pl.BlockSpec((KP, TB), lambda i: (0, i)),
        compiler_params=pltpu.CompilerParams(
            dimension_semantics=("parallel",),
            vmem_limit_bytes=32 * 1024 * 1024),
    )(xT, w1b, b1, w2b, b2, w3b, b3)

    return outT[:K, :B].T                     # (B, K) — layout plumbing only


def init_params(key, K, N):
    """Deterministic init mimicking nn.Linear default (U[-1/sqrt(fan_in), +])."""
    def linear(key, fan_in, fan_out):
        kw, kb = jax.random.split(key)
        bound = 1.0 / jnp.sqrt(fan_in)
        # stored as (out, in) like nn.Linear.weight; bias as (out, 1) so it
        # broadcasts over the lane/batch axis inside the kernel.
        w = jax.random.uniform(kw, (fan_out, fan_in), jnp.float32, -bound, bound)
        b = jax.random.uniform(kb, (fan_out, 1), jnp.float32, -bound, bound)
        return w, b

    k1, k2, k3 = jax.random.split(key, 3)
    w1, b1 = linear(k1, N, 32)
    w2, b2 = linear(k2, 32, 16)
    w3, b3 = linear(k3, 16, K)
    return {"w1": w1, "b1": b1, "w2": w2, "b2": b2, "w3": w3, "b3": b3}


if __name__ == "__main__":
    K, N, B = 4, 8, 2  # K arms, N features, batch of 2 observations

    key = jax.random.PRNGKey(0)
    pkey, xkey = jax.random.split(key)
    params = init_params(pkey, K, N)
    x = jax.random.normal(xkey, (B, N), jnp.float32)

    out = policy_net_forward(x, params)
    out = jax.block_until_ready(out)

    # Reference in plain JAX / f32 (nn.Linear semantics: y = x @ W.T + b).
    h = jax.nn.relu(x @ params["w1"].T + params["b1"].T)
    h = jax.nn.relu(h @ params["w2"].T + params["b2"].T)
    ref = jax.nn.softmax(h @ params["w3"].T + params["b3"].T, axis=-1)

    assert out.shape == (B, K)
    # bf16 matmul operands (f32 accumulation) -> allow ~1e-2 slack vs f32 ref.
    assert jnp.allclose(out, ref, atol=1e-2, rtol=1e-2), float(jnp.max(jnp.abs(out - ref)))
    # Exact softmax normalization: rows sum to 1 up to f32 rounding.
    assert jnp.allclose(jnp.sum(out, axis=-1), 1.0, atol=1e-5)

    print("KERNEL_OK")
</pallas_src>

<mosaic_0001>
module attributes {stable_mosaic.version = 11 : i64} {
  func.func @policy_net_kernel(%arg0: i32, %arg1: memref<8x128xbf16, #tpu.memory_space<vmem>>, %arg2: memref<32x8xbf16, #tpu.memory_space<vmem>>, %arg3: memref<32x1xf32, #tpu.memory_space<vmem>>, %arg4: memref<16x32xbf16, #tpu.memory_space<vmem>>, %arg5: memref<16x1xf32, #tpu.memory_space<vmem>>, %arg6: memref<8x16xbf16, #tpu.memory_space<vmem>>, %arg7: memref<8x1xf32, #tpu.memory_space<vmem>>, %arg8: memref<8x128xf32, #tpu.memory_space<vmem>>) attributes {dimension_semantics = [#tpu.dimension_semantics<parallel>], iteration_bounds = array<i64: 1>, scalar_prefetch = 0 : i64, scratch_operands = 0 : i64, tpu.core_type = #tpu.core_type<tc>, window_params = [{transform_indices = @transform_0, window_bounds = array<i64: 8, 128>}, {pipeline_mode = #tpu.pipeline_mode<synchronous>, transform_indices = @transform_1, window_bounds = array<i64: 32, 8>}, {pipeline_mode = #tpu.pipeline_mode<synchronous>, transform_indices = @transform_2, window_bounds = array<i64: 32, 1>}, {pipeline_mode = #tpu.pipeline_mode<synchronous>, transform_indices = @transform_3, window_bounds = array<i64: 16, 32>}, {pipeline_mode = #tpu.pipeline_mode<synchronous>, transform_indices = @transform_4, window_bounds = array<i64: 16, 1>}, {pipeline_mode = #tpu.pipeline_mode<synchronous>, transform_indices = @transform_5, window_bounds = array<i64: 8, 16>}, {pipeline_mode = #tpu.pipeline_mode<synchronous>, transform_indices = @transform_6, window_bounds = array<i64: 8, 1>}, {transform_indices = @transform_7, window_bounds = array<i64: 8, 128>}]} {
    %c0 = arith.constant 0 : index
    %c0_0 = arith.constant 0 : index
    %0 = vector.load %arg1[%c0, %c0_0] : memref<8x128xbf16, #tpu.memory_space<vmem>>, vector<8x128xbf16>
    %c0_1 = arith.constant 0 : index
    %c0_2 = arith.constant 0 : index
    %1 = vector.load %arg2[%c0_1, %c0_2] : memref<32x8xbf16, #tpu.memory_space<vmem>>, vector<32x8xbf16>
    %cst = arith.constant dense<0.000000e+00> : vector<32x128xf32>
    %2 = tpu.matmul %1, %0, %cst {dimension_numbers = #tpu.dot_dimension_numbers<[1], [0], [0], [1], [0, 0, 1, 1], [], []>} : vector<32x8xbf16>, vector<8x128xbf16>, vector<32x128xf32> -> vector<32x128xf32>
    %c0_3 = arith.constant 0 : index
    %c0_4 = arith.constant 0 : index
    %3 = vector.load %arg3[%c0_3, %c0_4] : memref<32x1xf32, #tpu.memory_space<vmem>>, vector<32x1xf32>
    %4 = vector.broadcast %3 : vector<32x1xf32> to vector<32x128xf32>
    %5 = arith.addf %2, %4 : vector<32x128xf32>
    %cst_5 = arith.constant 0.000000e+00 : f32
    %6 = vector.broadcast %cst_5 : f32 to vector<32x128xf32>
    %7 = arith.maximumf %5, %6 : vector<32x128xf32>
    %c0_6 = arith.constant 0 : index
    %c0_7 = arith.constant 0 : index
    %8 = vector.load %arg4[%c0_6, %c0_7] : memref<16x32xbf16, #tpu.memory_space<vmem>>, vector<16x32xbf16>
    %9 = arith.truncf %7 : vector<32x128xf32> to vector<32x128xbf16>
    %cst_8 = arith.constant dense<0.000000e+00> : vector<16x128xf32>
    %10 = tpu.matmul %8, %9, %cst_8 {dimension_numbers = #tpu.dot_dimension_numbers<[1], [0], [0], [1], [0, 0, 1, 1], [], []>} : vector<16x32xbf16>, vector<32x128xbf16>, vector<16x128xf32> -> vector<16x128xf32>
    %c0_9 = arith.constant 0 : index
    %c0_10 = arith.constant 0 : index
    %11 = vector.load %arg5[%c0_9, %c0_10] : memref<16x1xf32, #tpu.memory_space<vmem>>, vector<16x1xf32>
    %12 = vector.broadcast %11 : vector<16x1xf32> to vector<16x128xf32>
    %13 = arith.addf %10, %12 : vector<16x128xf32>
    %cst_11 = arith.constant 0.000000e+00 : f32
    %14 = vector.broadcast %cst_11 : f32 to vector<16x128xf32>
    %15 = arith.maximumf %13, %14 : vector<16x128xf32>
    %c0_12 = arith.constant 0 : index
    %c0_13 = arith.constant 0 : index
    %16 = vector.load %arg6[%c0_12, %c0_13] : memref<8x16xbf16, #tpu.memory_space<vmem>>, vector<8x16xbf16>
    %17 = arith.truncf %15 : vector<16x128xf32> to vector<16x128xbf16>
    %cst_14 = arith.constant dense<0.000000e+00> : vector<8x128xf32>
    %18 = tpu.matmul %16, %17, %cst_14 {dimension_numbers = #tpu.dot_dimension_numbers<[1], [0], [0], [1], [0, 0, 1, 1], [], []>} : vector<8x16xbf16>, vector<16x128xbf16>, vector<8x128xf32> -> vector<8x128xf32>
    %c0_15 = arith.constant 0 : index
    %c0_16 = arith.constant 0 : index
    %19 = vector.load %arg7[%c0_15, %c0_16] : memref<8x1xf32, #tpu.memory_space<vmem>>, vector<8x1xf32>
    %20 = vector.broadcast %19 : vector<8x1xf32> to vector<8x128xf32>
    %21 = arith.addf %18, %20 : vector<8x128xf32>
    %cst_17 = arith.constant dense<0xFF800000> : vector<128xf32>
    %22 = vector.multi_reduction <maximumf>, %21, %cst_17 [0] : vector<8x128xf32> to vector<128xf32>
    %23 = vector.shape_cast %22 : vector<128xf32> to vector<1x128xf32>
    %24 = vector.broadcast %23 : vector<1x128xf32> to vector<8x128xf32>
    %25 = arith.subf %21, %24 : vector<8x128xf32>
    %26 = math.exp %25 : vector<8x128xf32>
    %cst_18 = arith.constant dense<0.000000e+00> : vector<128xf32>
    %27 = vector.multi_reduction <add>, %26, %cst_18 [0] : vector<8x128xf32> to vector<128xf32>
    %28 = vector.shape_cast %27 : vector<128xf32> to vector<1x128xf32>
    %29 = vector.broadcast %28 : vector<1x128xf32> to vector<8x128xf32>
    %30 = arith.divf %26, %29 : vector<8x128xf32>
    %c0_19 = arith.constant 0 : index
    %c0_20 = arith.constant 0 : index
    %31 = vector.load %arg8[%c0_19, %c0_20] : memref<8x128xf32, #tpu.memory_space<vmem>>, vector<8x128xf32>
    tpu.vector_store %arg8[%c0_19, %c0_20], %30 {strides = array<i32>} : memref<8x128xf32, #tpu.memory_space<vmem>>, vector<8x128xf32>,
    return
  }
  func.func @transform_0(%arg0: i32) -> (i32, i32) {
    %c0_i32 = arith.constant 0 : i32
    %c0_i32_0 = arith.constant 0 : i32
    return %c0_i32, %arg0 : i32, i32
  }
  func.func @transform_1(%arg0: i32) -> (i32, i32) {
    %c0_i32 = arith.constant 0 : i32
    %c0_i32_0 = arith.constant 0 : i32
    %c0_i32_1 = arith.constant 0 : i32
    return %c0_i32, %c0_i32_0 : i32, i32
  }
  func.func @transform_2(%arg0: i32) -> (i32, i32) {
    %c0_i32 = arith.constant 0 : i32
    %c0_i32_0 = arith.constant 0 : i32
    %c0_i32_1 = arith.constant 0 : i32
    return %c0_i32, %c0_i32_0 : i32, i32
  }
  func.func @transform_3(%arg0: i32) -> (i32, i32) {
    %c0_i32 = arith.constant 0 : i32
    %c0_i32_0 = arith.constant 0 : i32
    %c0_i32_1 = arith.constant 0 : i32
    return %c0_i32, %c0_i32_0 : i32, i32
  }
  func.func @transform_4(%arg0: i32) -> (i32, i32) {
    %c0_i32 = arith.constant 0 : i32
    %c0_i32_0 = arith.constant 0 : i32
    %c0_i32_1 = arith.constant 0 : i32
    return %c0_i32, %c0_i32_0 : i32, i32
  }
  func.func @transform_5(%arg0: i32) -> (i32, i32) {
    %c0_i32 = arith.constant 0 : i32
    %c0_i32_0 = arith.constant 0 : i32
    %c0_i32_1 = arith.constant 0 : i32
    return %c0_i32, %c0_i32_0 : i32, i32
  }
  func.func @transform_6(%arg0: i32) -> (i32, i32) {
    %c0_i32 = arith.constant 0 : i32
    %c0_i32_0 = arith.constant 0 : i32
    %c0_i32_1 = arith.constant 0 : i32
    return %c0_i32, %c0_i32_0 : i32, i32
  }
  func.func @transform_7(%arg0: i32) -> (i32, i32) {
    %c0_i32 = arith.constant 0 : i32
    %c0_i32_0 = arith.constant 0 : i32
    return %c0_i32, %arg0 : i32, i32
  }
}

</mosaic_0001>

<bundles_post_ra>
// kernel: policy_net_forward.1
= control target key start
LH: loop header
LB: loop body
LE: loop exit
PB: predicated region body
PF: predicated region fallthrough
CT: control target
= control target key end

     0   :  { %vm73_vm0 = vcmask 1043456   ;;  %vm66_vm1 = vcmask 64512   ;;  %v320_v1 = vmov 0   ;;  %v321_v12 = vmov 0.0   ;;  %s404_s0 = inlined_call_operand.vmem [shape: bf16[8,128], index: 0, kind: input, shape index: {}]   ;;  %s405_s1 = inlined_call_operand.vmem [shape: bf16[32,8], index: 1, kind: input, shape index: {}]   ;;  %s406_s2 = inlined_call_operand.vmem [shape: f32[32,1], index: 2, kind: input, shape index: {}]   ;;  %s407_s4 = inlined_call_operand.vmem [shape: f32[16,1], index: 4, kind: input, shape index: {}]   ;;  %s408_s6 = inlined_call_operand.vmem [shape: f32[8,1], index: 6, kind: input, shape index: {}]   ;;  %s409_s3 = inlined_call_operand.vmem [shape: bf16[16,32], index: 3, kind: input, shape index: {}]   ;;  %s410_s5 = inlined_call_operand.vmem [shape: bf16[8,16], index: 5, kind: input, shape index: {}]   ;;  %s411_s7 = inlined_call_operand.vmem [shape: f32[8,128], index: 7, kind: output, shape index: {}]  }
   0x1   :  { %v27_v0 = vld [vmem:[%s404_s0] sm:$0xf]  ;;  %311 = vset.pattern.permute.xlu0 %v320_v1  ;;  %312 = vset.pattern.permute.xlu1 %v320_v1  ;;  %v314_v4 = vld [vmem:[%s405_s1 + $0x8] sm:$0xff]   ;;  %v34_v6 = vld [vmem:[%s406_s2 + $0x10] sm:$0xff]  ;;  %vm322_vm2 = vmmov 0   ;;  %vm151_vm3 = vcmask 261120  }
   0x2   :  { %307 = vmatprep.subr.msk.bf16.mxu0 %vm73_vm0, %v27_v0  ;;  %v75_v2 = vsel %vm73_vm0, %v27_v0, 0  ;;  %v313_v3 = vld [vmem:[%s405_s1] sm:$0xff]   ;;  %v33_v7 = vld [vmem:[%s406_s2 + $0x8] sm:$0xff]  ;;  %48 = vperm.xlu1 %312, %v34_v6   ;;  %v35_v8 = vld [vmem:[%s406_s2 + $0x18] sm:$0xff]  ;;  %vm206_vm4 = vcmask 130048  }
   0x3   :  { %288 = vmatpush3.bf16.msra.mxu0 %v75_v2  ;;  %v32_v5 = vld [vmem:[%s406_s2] sm:$0xff]  ;;  %289 = vmatprep.mubr.msk.bf16.mxu0 %vm66_vm1, %v313_v3  ;;  %v135_v10 = vld [vmem:[%s407_s4 + $0x8] sm:$0xff] }
   0x4   :  { %38 = vperm.xlu0 %311, %v32_v5   ;;  %v134_v9 = vld [vmem:[%s407_s4] sm:$0xff]  ;;  %293 = vmatprep.subr.bf16.mxu1 %v321_v12 }
   0x5   :  { %v200_v11 = vld [vmem:[%s408_s6] sm:$0xff]  ;;  %301 = vmatprep.subr.bf16.mxu0 %v321_v12  ;;  %297 = vmatprep.mubr.msk.bf16.mxu1 %vm322_vm2, %v321_v12 }
   0x6   :  { %290 = vmatmul.mubr.msk.bf16.vlgmr.msra.gmra.mrb[0].mxu0 %vm66_vm1, %v314_v4  ;;  %53 = vperm.xlu1 %312, %v35_v8   ;;  %v315_v31 = vld [vmem:[%s409_s3] sm:$0xff]  }
   0x7   :  { %303 = vmatprep.mubr.msk.bf16.mxu0 %vm322_vm2, %v321_v12  ;;  %v198_v43 = vld [vmem:[%s410_s5] sm:$0xf] }
   0x8   :  { %43 = vperm.xlu0 %311, %v33_v7  }
   0xa   :  { %143 = vperm.xlu1 %312, %v135_v10  }
   0xc   :  { %138 = vperm.xlu0 %311, %v134_v9  }
  0x10   :  { %203 = vperm.xlu0 %311, %v200_v11  }
  0x81   :  { %v49_v13 = vpop.permute.xlu1 %48 }
  0x83   :  { %v39_v14 = vpop.permute.xlu0 %38 }
  0x85   :  { %v54_v18 = vpop.permute.xlu1 %53 }
  0x87   :  { %v44_v21 = vpop.permute.xlu0 %43 }
  0x89   :  { %v144_v36 = vpop.permute.xlu1 %143 }
  0x8b   :  { %v139_v32 = vpop.permute.xlu0 %138 }
  0x8f   :  { %v204_v44 = vpop.permute.xlu0 %203 }
  0xd9   :  { %v291_v15 = vpop.f32.mrb[0].mxu0 }
  0xda   :  { %v120_v16 = vadd.f32 %v291_v15, %v49_v13  ;;  %v111_v17 = vpop.f32.mrb[1].mxu0 }
  0xdb   :  { %v112_v19 = vadd.f32 %v111_v17, %v39_v14  ;;  %v292_v20 = vpop.f32.mrb[2].mxu0 }
  0xdc   :  { %v123_v22 = vadd.f32 %v292_v20, %v54_v18  ;;  %v114_v23 = vpop.f32.mrb[3].mxu0  ;;  %v128_v25 = vmax.f32 %v120_v16, 0.0 }
  0xdd   :  { %v115_v24 = vadd.f32 %v114_v23, %v44_v21  ;;  %v126_v27 = vmax.f32 %v112_v19, 0.0 }
  0xde   :  { %v129_v26 = vmax.f32 %v123_v22, 0.0 }
  0xdf   :  { %v127_v28 = vmax.f32 %v115_v24, 0.0 }
  0xe0   :  { %v133_v29 = vpack.c.bf16 %v129_v26, %v128_v25 }
  0xe1   :  { %v132_v30 = vpack.c.bf16 %v127_v28, %v126_v27 }
  0xe3   :  { %294 = vmatpush3.bf16.msra.mxu1 %v132_v30 }
  0xe4   :  { %295 = vmatprep.subr.bf16.mxu1 %v321_v12 }
  0xe7   :  { %296 = vmatpush3.bf16.msra.mxu1 %v133_v29 }
  0xea   :  { %298 = vmatmul.mubr.msk.bf16.vlgmr.msra.gmra.mrb[0].mxu1 %vm151_vm3, %v315_v31 }
 0x1bd   :  { %v189_v33 = vpop.f32.mrb[0].mxu1 }
 0x1be   :  { %v190_v34 = vadd.f32 %v189_v33, %v139_v32  ;;  %v299_v35 = vpop.f32.mrb[1].mxu1 }
 0x1bf   :  { %v192_v37 = vpop.f32.mrb[2].mxu1 }
 0x1c0   :  { %v193_v38 = vadd.f32 %v192_v37, %v144_v36  ;;  %v300_v39 = vpop.f32.mrb[3].mxu1  ;;  %v196_v40 = vmax.f32 %v190_v34, 0.0 }
 0x1c2   :  { %v197_v41 = vmax.f32 %v193_v38, 0.0 }
 0x1c4   :  { %v199_v42 = vpack.c.bf16 %v197_v41, %v196_v40 }
 0x1c6   :  { %302 = vmatpush3.bf16.msra.mxu0 %v199_v42 }
 0x1c9   :  { %304 = vmatmul.mubr.msk.bf16.vlgmr.msra.gmra.mrb[4].mxu0 %vm206_vm4, %v198_v43 }
 0x29c   :  { %v244_v45 = vpop.f32.mrb[4].mxu0 }
 0x29d   :  { %v245_v46 = vadd.f32 %v244_v45, %v204_v44  ;;  %v305_v47 = vpop.f32.mrb[5].mxu0 }
 0x29e   :  { %v247_v48 = vpop.f32.mrb[6].mxu0 }
 0x29f   :  { %v250_v49 = vrot.slane %v245_v46, 4  ;;  %v306_v50 = vpop.f32.mrb[7].mxu0 }
 0x2a1   :  { %v251_v51 = vmax.f32 %v245_v46, %v250_v49 }
 0x2a3   :  { %v252_v52 = vrot.slane %v251_v51, 2 }
 0x2a5   :  { %v253_v53 = vmax.f32 %v251_v51, %v252_v52 }
 0x2a7   :  { %v254_v54 = vrot.slane %v253_v53, 1 }
 0x2a9   :  { %v255_v55 = vmax.f32 %v253_v53, %v254_v54 }
 0x2ab   :  { %v256_v56 = vsub.f32 %v245_v46, %v255_v55 }
 0x2ad   :  { %v257_v57 = vmul.f32 1.442695, %v256_v56 }
 0x2af   :  { %316 = vpow2.f32 %v257_v57 }
 0x2b9   :  { %v317_v58 = vpop.eup %316 }
 0x2ba   :  { %v259_v59 = vrot.slane %v317_v58, 4 }
 0x2bc   :  { %v260_v60 = vadd.f32 %v317_v58, %v259_v59 }
 0x2be   :  { %v261_v61 = vrot.slane %v260_v60, 2 }
 0x2c0   :  { %v262_v62 = vadd.f32 %v261_v61, %v260_v60 }
 0x2c2   :  { %v263_v63 = vrot.slane %v262_v62, 1 }
 0x2c4   :  { %v264_v0 = vadd.f32 %v263_v63, %v262_v62 }
 0x2c6   :  { %318 = vrcp.f32 %v264_v0 }
 0x2d0   :  { %v319_v1 = vpop.eup %318 }
 0x2d1   :  { %v266_v2 = vmul.f32 %v319_v1, %v317_v58 }
 0x2d3   :  { %267 = vst [vmem:[%s411_s7] sm:$0xff] %v266_v2 }

</bundles_post_ra>
